<compile_context>
chip_gen: v5e
topology: v5e:2x2
jax: 0.10.0
libtpu: 0.0.40
codegen_flags: <defaults>
</compile_context>

<pallas_src>
import functools
import math

import jax
import jax.numpy as jnp
from jax.experimental import pallas as pl
from jax.experimental.pallas import tpu as pltpu


def _round_up(x, m):
    return (x + m - 1) // m * m


def lstm_kernel(g_ref, whh_ref, wlin_ref, blin_ref, h0_ref, c0_ref,
                y_ref, hN_ref, cN_ref, h_all,
                *, hidden, t_chunk, seq_len):
    c_idx = pl.program_id(0)
    H = hidden

    # First chunk: load the initial hidden state into the resident carries.
    @pl.when(c_idx == 0)
    def _():
        hN_ref[...] = h0_ref[...]
        cN_ref[...] = c0_ref[...]
        h_all[...] = jnp.zeros_like(h_all)   # only matters for the padded tail

    whh = whh_ref[...]                        # (H, 4H), hoisted out of the loop

    # Number of real (non-padded) timesteps handled by this chunk.
    n_steps = jnp.minimum(t_chunk, seq_len - c_idx * t_chunk)

    def step(t, carry):
        h = hN_ref[...]                       # (B, H) carried state (VMEM resident)
        c = cN_ref[...]
        # Gates, PyTorch order [i, f, g, o]; x @ W_ih^T + b was precomputed.
        gates = g_ref[t] + jnp.dot(h, whh, preferred_element_type=jnp.float32)
        i_g = jax.nn.sigmoid(gates[:, 0:H])
        f_g = jax.nn.sigmoid(gates[:, H:2 * H])
        g_g = jnp.tanh(gates[:, 2 * H:3 * H])
        o_g = jax.nn.sigmoid(gates[:, 3 * H:4 * H])
        c_new = f_g * c + i_g * g_g
        h_new = o_g * jnp.tanh(c_new)
        hN_ref[...] = h_new
        cN_ref[...] = c_new
        h_all[t] = h_new                      # stage for the fused conv head
        return carry

    jax.lax.fori_loop(0, n_steps, step, 0)

    # Fused Conv1d(hidden, 1, kernel_size=1) head, batched over the whole chunk
    # (VPU multiply + lane reduce, off the serial recurrence path). One dense
    # store per chunk instead of one width-1 store per timestep.
    y = jnp.sum(h_all[...] * wlin_ref[...], axis=-1) + blin_ref[...]   # (t_chunk, B)
    y_ref[...] = y


def lstm_forward(X, params, hidden=None, t_chunk=128):
    """X: (B, T, P) batch_first.  Returns (Y (B, T, 1), (h_n, c_n) each (1, B, H))."""
    X = jnp.asarray(X, jnp.float32)
    B, T, P = X.shape
    H = params["w_hh"].shape[0]
    four_h = 4 * H

    B_pad = _round_up(B, 8)                       # fill f32 sublanes
    t_chunk = min(t_chunk, _round_up(T, 8))
    n_chunks = pl.cdiv(T, t_chunk)
    T_pad = n_chunks * t_chunk

    # Time-major, zero-padded input.
    x_tm = jnp.transpose(X, (1, 0, 2))                               # (T, B, P)
    x_tm = jnp.pad(x_tm, ((0, T_pad - T), (0, B_pad - B), (0, 0)))

    # Hoisted input projection: one big MXU-friendly matmul, off the serial path.
    gates_x = jnp.dot(x_tm.reshape(T_pad * B_pad, P), params["w_ih"],
                      precision=jax.lax.Precision.HIGHEST) + params["b"]
    gates_x = gates_x.reshape(T_pad, B_pad, four_h)

    if hidden is None:
        h0 = jnp.zeros((B_pad, H), jnp.float32)
        c0 = jnp.zeros((B_pad, H), jnp.float32)
    else:
        h0 = jnp.zeros((B_pad, H), jnp.float32).at[:B].set(hidden[0][0].astype(jnp.float32))
        c0 = jnp.zeros((B_pad, H), jnp.float32).at[:B].set(hidden[1][0].astype(jnp.float32))

    kernel = functools.partial(lstm_kernel, hidden=H, t_chunk=t_chunk, seq_len=T)
    y_tm, hN, cN = pl.pallas_call(
        kernel,
        out_shape=(
            jax.ShapeDtypeStruct((T_pad, B_pad), jnp.float32),
            jax.ShapeDtypeStruct((B_pad, H), jnp.float32),
            jax.ShapeDtypeStruct((B_pad, H), jnp.float32),
        ),
        grid_spec=pltpu.PrefetchScalarGridSpec(
            num_scalar_prefetch=0,
            grid=(n_chunks,),
            in_specs=[
                pl.BlockSpec((t_chunk, B_pad, four_h), lambda c: (c, 0, 0)),  # precomputed x-gates
                pl.BlockSpec((H, four_h), lambda c: (0, 0)),                  # W_hh^T
                pl.BlockSpec((1, H), lambda c: (0, 0)),                       # conv weight row
                pl.BlockSpec((1, 1), lambda c: (0, 0)),                       # conv bias
                pl.BlockSpec((B_pad, H), lambda c: (0, 0)),                   # h0
                pl.BlockSpec((B_pad, H), lambda c: (0, 0)),                   # c0
            ],
            out_specs=[
                pl.BlockSpec((t_chunk, B_pad), lambda c: (c, 0)),             # y chunk
                pl.BlockSpec((B_pad, H), lambda c: (0, 0)),                   # h_n (resident carry)
                pl.BlockSpec((B_pad, H), lambda c: (0, 0)),                   # c_n (resident carry)
            ],
            scratch_shapes=[
                pltpu.VMEM((t_chunk, B_pad, H), jnp.float32),                 # per-chunk h staging
            ],
        ),
        compiler_params=pltpu.CompilerParams(
            dimension_semantics=("arbitrary",),       # sequential recurrence
            vmem_limit_bytes=32 * 1024 * 1024,
        ),
    )(gates_x, params["w_hh"], params["w_lin"], params["b_lin"], h0, c0)

    Y = jnp.transpose(y_tm[:T, :B])[:, :, None]       # (B, T, 1)
    return Y, (hN[None, :B], cN[None, :B])


def make_params(key, num_series, hidden):
    """Deterministic init matching PyTorch parameter shapes (stored pre-transposed)."""
    k_lstm = 1.0 / math.sqrt(hidden)
    k_lin = 1.0 / math.sqrt(hidden)               # Conv1d: 1/sqrt(in_channels * kernel)
    ks = jax.random.split(key, 6)
    w_ih = jax.random.uniform(ks[0], (4 * hidden, num_series), jnp.float32, -k_lstm, k_lstm)
    w_hh = jax.random.uniform(ks[1], (4 * hidden, hidden), jnp.float32, -k_lstm, k_lstm)
    b_ih = jax.random.uniform(ks[2], (4 * hidden,), jnp.float32, -k_lstm, k_lstm)
    b_hh = jax.random.uniform(ks[3], (4 * hidden,), jnp.float32, -k_lstm, k_lstm)
    w_conv = jax.random.uniform(ks[4], (1, hidden, 1), jnp.float32, -k_lin, k_lin)
    b_conv = jax.random.uniform(ks[5], (1,), jnp.float32, -k_lin, k_lin)
    return {
        "w_ih": w_ih.T,                       # (P, 4H)
        "w_hh": w_hh.T,                       # (H, 4H)
        "b": (b_ih + b_hh)[None, :],          # (1, 4H)
        "w_lin": w_conv[0, :, 0][None, :],    # (1, H)
        "b_lin": b_conv[None, :],             # (1, 1)
    }


def ref_forward(X, params):
    """Pure-JAX reference (same math as torch.nn.LSTM(batch_first) + Conv1d(H,1,1))."""
    X = jnp.asarray(X, jnp.float32)
    B, T, P = X.shape
    wih, whh, b = params["w_ih"], params["w_hh"], params["b"][0]
    H = whh.shape[0]
    hi = jax.lax.Precision.HIGHEST

    def step(carry, x_t):
        h, c = carry
        gates = jnp.dot(x_t, wih, precision=hi) + jnp.dot(h, whh, precision=hi) + b
        i = jax.nn.sigmoid(gates[:, :H])
        f = jax.nn.sigmoid(gates[:, H:2 * H])
        g = jnp.tanh(gates[:, 2 * H:3 * H])
        o = jax.nn.sigmoid(gates[:, 3 * H:])
        c = f * c + i * g
        h = o * jnp.tanh(c)
        return (h, c), h

    init = (jnp.zeros((B, H), jnp.float32), jnp.zeros((B, H), jnp.float32))
    (h, c), hs = jax.lax.scan(step, init, jnp.transpose(X, (1, 0, 2)))
    hs = jnp.transpose(hs, (1, 0, 2))                                   # (B, T, H)
    Y = jnp.dot(hs, params["w_lin"].T, precision=hi) + params["b_lin"][0, 0]
    return Y, (h[None], c[None])


if __name__ == "__main__":
    key = jax.random.PRNGKey(0)

    configs = [
        # (batch, seq_len, num_series, hidden)
        (4, 8, 8, 32),       # small, single chunk
        (3, 300, 8, 32),     # multi-chunk + padded batch + ragged tail chunk
    ]
    for idx, (B, T, P, H) in enumerate(configs):
        k_x, k_p = jax.random.split(jax.random.fold_in(key, idx))
        X = jax.random.normal(k_x, (B, T, P), jnp.float32)
        params = make_params(k_p, P, H)

        Y, (h_n, c_n) = lstm_forward(X, params)
        jax.block_until_ready((Y, h_n, c_n))

        Y_ref, (h_ref, c_ref) = ref_forward(X, params)
        assert Y.shape == (B, T, 1) and h_n.shape == (1, B, H) and c_n.shape == (1, B, H)
        assert jnp.allclose(Y, Y_ref, atol=1e-4, rtol=1e-4), f"Y mismatch (config {idx})"
        assert jnp.allclose(h_n, h_ref, atol=1e-4, rtol=1e-4), f"h_n mismatch (config {idx})"
        assert jnp.allclose(c_n, c_ref, atol=1e-4, rtol=1e-4), f"c_n mismatch (config {idx})"

    print("KERNEL_OK")
</pallas_src>

<mosaic_0001>
module attributes {stable_mosaic.version = 11 : i64} {
  func.func @lstm_kernel(%arg0: i32, %arg1: memref<8x8x128xf32, #tpu.memory_space<vmem>>, %arg2: memref<32x128xf32, #tpu.memory_space<vmem>>, %arg3: memref<1x32xf32, #tpu.memory_space<vmem>>, %arg4: memref<1x1xf32, #tpu.memory_space<vmem>>, %arg5: memref<8x32xf32, #tpu.memory_space<vmem>>, %arg6: memref<8x32xf32, #tpu.memory_space<vmem>>, %arg7: memref<8x8xf32, #tpu.memory_space<vmem>>, %arg8: memref<8x32xf32, #tpu.memory_space<vmem>>, %arg9: memref<8x32xf32, #tpu.memory_space<vmem>>, %arg10: memref<8x8x32xf32, #tpu.memory_space<vmem>>) attributes {dimension_semantics = [#tpu.dimension_semantics<arbitrary>], iteration_bounds = array<i64: 1>, scalar_prefetch = 0 : i64, scratch_operands = 1 : i64, tpu.core_type = #tpu.core_type<tc>, window_params = [{transform_indices = @transform_0, window_bounds = array<i64: 8, 8, 128>}, {pipeline_mode = #tpu.pipeline_mode<synchronous>, transform_indices = @transform_1, window_bounds = array<i64: 32, 128>}, {pipeline_mode = #tpu.pipeline_mode<synchronous>, transform_indices = @transform_2, window_bounds = array<i64: 1, 32>}, {pipeline_mode = #tpu.pipeline_mode<synchronous>, transform_indices = @transform_3, window_bounds = array<i64: 1, 1>}, {pipeline_mode = #tpu.pipeline_mode<synchronous>, transform_indices = @transform_4, window_bounds = array<i64: 8, 32>}, {pipeline_mode = #tpu.pipeline_mode<synchronous>, transform_indices = @transform_5, window_bounds = array<i64: 8, 32>}, {transform_indices = @transform_6, window_bounds = array<i64: 8, 8>}, {pipeline_mode = #tpu.pipeline_mode<synchronous>, transform_indices = @transform_7, window_bounds = array<i64: 8, 32>}, {pipeline_mode = #tpu.pipeline_mode<synchronous>, transform_indices = @transform_8, window_bounds = array<i64: 8, 32>}]} {
    %c0_i32 = arith.constant 0 : i32
    %0 = arith.cmpi eq, %arg0, %c0_i32 : i32
    %1 = arith.extui %0 : i1 to i32
    %c0_i32_0 = arith.constant 0 : i32
    %2 = arith.cmpi ne, %1, %c0_i32_0 : i32
    scf.if %2 {
      %c0_15 = arith.constant 0 : index
      %c0_16 = arith.constant 0 : index
      %19 = vector.load %arg5[%c0_15, %c0_16] : memref<8x32xf32, #tpu.memory_space<vmem>>, vector<8x32xf32>
      %c0_17 = arith.constant 0 : index
      %c0_18 = arith.constant 0 : index
      %20 = vector.load %arg8[%c0_17, %c0_18] : memref<8x32xf32, #tpu.memory_space<vmem>>, vector<8x32xf32>
      tpu.vector_store %arg8[%c0_17, %c0_18], %19 {strides = array<i32>} : memref<8x32xf32, #tpu.memory_space<vmem>>, vector<8x32xf32>,
      %c0_19 = arith.constant 0 : index
      %c0_20 = arith.constant 0 : index
      %21 = vector.load %arg6[%c0_19, %c0_20] : memref<8x32xf32, #tpu.memory_space<vmem>>, vector<8x32xf32>
      %c0_21 = arith.constant 0 : index
      %c0_22 = arith.constant 0 : index
      %22 = vector.load %arg9[%c0_21, %c0_22] : memref<8x32xf32, #tpu.memory_space<vmem>>, vector<8x32xf32>
      tpu.vector_store %arg9[%c0_21, %c0_22], %21 {strides = array<i32>} : memref<8x32xf32, #tpu.memory_space<vmem>>, vector<8x32xf32>,
      %cst_23 = arith.constant 0.000000e+00 : f32
      %23 = vector.broadcast %cst_23 : f32 to vector<8x8x32xf32>
      %c0_24 = arith.constant 0 : index
      %c0_25 = arith.constant 0 : index
      %c0_26 = arith.constant 0 : index
      %24 = vector.load %arg10[%c0_24, %c0_25, %c0_26] : memref<8x8x32xf32, #tpu.memory_space<vmem>>, vector<8x8x32xf32>
      tpu.vector_store %arg10[%c0_24, %c0_25, %c0_26], %23 {strides = array<i32>} : memref<8x8x32xf32, #tpu.memory_space<vmem>>, vector<8x8x32xf32>,
    } else {
    }
    %c0 = arith.constant 0 : index
    %c0_1 = arith.constant 0 : index
    %3 = vector.load %arg2[%c0, %c0_1] : memref<32x128xf32, #tpu.memory_space<vmem>>, vector<32x128xf32>
    %c8_i32 = arith.constant 8 : i32
    %4 = arith.muli %arg0, %c8_i32 : i32
    %c8_i32_2 = arith.constant 8 : i32
    %5 = arith.subi %c8_i32_2, %4 : i32
    %c8_i32_3 = arith.constant 8 : i32
    %6 = arith.minsi %c8_i32_3, %5 : i32
    %c0_i32_4 = arith.constant 0 : i32
    %c0_i32_5 = arith.constant 0 : i32
    %7 = arith.subi %6, %c0_i32_5 : i32
    %8 = arith.addi %c0_i32_5, %7 : i32
    %c1_i32 = arith.constant 1 : i32
    scf.for %arg11 = %c0_i32_5 to %8 step %c1_i32  : i32 {
      %c0_15 = arith.constant 0 : index
      %c0_16 = arith.constant 0 : index
      %19 = vector.load %arg8[%c0_15, %c0_16] : memref<8x32xf32, #tpu.memory_space<vmem>>, vector<8x32xf32>
      %c0_17 = arith.constant 0 : index
      %c0_18 = arith.constant 0 : index
      %20 = vector.load %arg9[%c0_17, %c0_18] : memref<8x32xf32, #tpu.memory_space<vmem>>, vector<8x32xf32>
      %21 = arith.index_cast %arg11 : i32 to index
      %c0_19 = arith.constant 0 : index
      %c0_20 = arith.constant 0 : index
      %22 = vector.load %arg1[%21, %c0_19, %c0_20] : memref<8x8x128xf32, #tpu.memory_space<vmem>>, vector<1x8x128xf32>
      %23 = vector.shape_cast %22 : vector<1x8x128xf32> to vector<8x128xf32>
      %cst_21 = arith.constant dense<0.000000e+00> : vector<8x128xf32>
      %24 = tpu.matmul %19, %3, %cst_21 {dimension_numbers = #tpu.dot_dimension_numbers<[1], [0], [0], [1], [0, 0, 1, 1], [], []>} : vector<8x32xf32>, vector<32x128xf32>, vector<8x128xf32> -> vector<8x128xf32>
      %25 = arith.addf %23, %24 : vector<8x128xf32>
      %26 = vector.extract_strided_slice %25 {offsets = [0, 0], sizes = [8, 32], strides = [1, 1]} : vector<8x128xf32> to vector<8x32xf32>
      %27 = arith.negf %26 : vector<8x32xf32>
      %28 = math.exp %27 : vector<8x32xf32>
      %cst_22 = arith.constant 1.000000e+00 : f32
      %29 = vector.broadcast %cst_22 : f32 to vector<8x32xf32>
      %30 = arith.addf %29, %28 : vector<8x32xf32>
      %31 = arith.divf %29, %30 : vector<8x32xf32>
      %32 = vector.extract_strided_slice %25 {offsets = [0, 32], sizes = [8, 32], strides = [1, 1]} : vector<8x128xf32> to vector<8x32xf32>
      %33 = arith.negf %32 : vector<8x32xf32>
      %34 = math.exp %33 : vector<8x32xf32>
      %cst_23 = arith.constant 1.000000e+00 : f32
      %35 = vector.broadcast %cst_23 : f32 to vector<8x32xf32>
      %36 = arith.addf %35, %34 : vector<8x32xf32>
      %37 = arith.divf %35, %36 : vector<8x32xf32>
      %38 = vector.extract_strided_slice %25 {offsets = [0, 64], sizes = [8, 32], strides = [1, 1]} : vector<8x128xf32> to vector<8x32xf32>
      %39 = math.tanh %38 : vector<8x32xf32>
      %40 = vector.extract_strided_slice %25 {offsets = [0, 96], sizes = [8, 32], strides = [1, 1]} : vector<8x128xf32> to vector<8x32xf32>
      %41 = arith.negf %40 : vector<8x32xf32>
      %42 = math.exp %41 : vector<8x32xf32>
      %cst_24 = arith.constant 1.000000e+00 : f32
      %43 = vector.broadcast %cst_24 : f32 to vector<8x32xf32>
      %44 = arith.addf %43, %42 : vector<8x32xf32>
      %45 = arith.divf %43, %44 : vector<8x32xf32>
      %46 = arith.mulf %37, %20 : vector<8x32xf32>
      %47 = arith.mulf %31, %39 : vector<8x32xf32>
      %48 = arith.addf %46, %47 : vector<8x32xf32>
      %49 = math.tanh %48 : vector<8x32xf32>
      %50 = arith.mulf %45, %49 : vector<8x32xf32>
      %c0_25 = arith.constant 0 : index
      %c0_26 = arith.constant 0 : index
      %51 = vector.load %arg8[%c0_25, %c0_26] : memref<8x32xf32, #tpu.memory_space<vmem>>, vector<8x32xf32>
      tpu.vector_store %arg8[%c0_25, %c0_26], %50 {strides = array<i32>} : memref<8x32xf32, #tpu.memory_space<vmem>>, vector<8x32xf32>,
      %c0_27 = arith.constant 0 : index
      %c0_28 = arith.constant 0 : index
      %52 = vector.load %arg9[%c0_27, %c0_28] : memref<8x32xf32, #tpu.memory_space<vmem>>, vector<8x32xf32>
      tpu.vector_store %arg9[%c0_27, %c0_28], %48 {strides = array<i32>} : memref<8x32xf32, #tpu.memory_space<vmem>>, vector<8x32xf32>,
      %53 = arith.index_cast %arg11 : i32 to index
      %c0_29 = arith.constant 0 : index
      %c0_30 = arith.constant 0 : index
      %54 = vector.load %arg10[%53, %c0_29, %c0_30] : memref<8x8x32xf32, #tpu.memory_space<vmem>>, vector<1x8x32xf32>
      %55 = vector.shape_cast %54 : vector<1x8x32xf32> to vector<8x32xf32>
      %56 = vector.shape_cast %50 : vector<8x32xf32> to vector<1x8x32xf32>
      tpu.vector_store %arg10[%53, %c0_29, %c0_30], %56 {strides = array<i32>} : memref<8x8x32xf32, #tpu.memory_space<vmem>>, vector<1x8x32xf32>,
    }
    %c0_6 = arith.constant 0 : index
    %c0_7 = arith.constant 0 : index
    %c0_8 = arith.constant 0 : index
    %9 = vector.load %arg10[%c0_6, %c0_7, %c0_8] : memref<8x8x32xf32, #tpu.memory_space<vmem>>, vector<8x8x32xf32>
    %c0_9 = arith.constant 0 : index
    %c0_10 = arith.constant 0 : index
    %10 = vector.load %arg3[%c0_9, %c0_10] : memref<1x32xf32, #tpu.memory_space<vmem>>, vector<1x32xf32>
    %11 = vector.shape_cast %10 : vector<1x32xf32> to vector<1x1x32xf32>
    %12 = vector.broadcast %11 : vector<1x1x32xf32> to vector<8x8x32xf32>
    %13 = arith.mulf %9, %12 : vector<8x8x32xf32>
    %cst = arith.constant dense<0.000000e+00> : vector<8x8xf32>
    %14 = vector.multi_reduction <add>, %13, %cst [2] : vector<8x8x32xf32> to vector<8x8xf32>
    %c0_11 = arith.constant 0 : index
    %c0_12 = arith.constant 0 : index
    %15 = vector.load %arg4[%c0_11, %c0_12] : memref<1x1xf32, #tpu.memory_space<vmem>>, vector<1x1xf32>
    %16 = vector.broadcast %15 : vector<1x1xf32> to vector<8x8xf32>
    %17 = arith.addf %14, %16 : vector<8x8xf32>
    %c0_13 = arith.constant 0 : index
    %c0_14 = arith.constant 0 : index
    %18 = vector.load %arg7[%c0_13, %c0_14] : memref<8x8xf32, #tpu.memory_space<vmem>>, vector<8x8xf32>
    tpu.vector_store %arg7[%c0_13, %c0_14], %17 {strides = array<i32>} : memref<8x8xf32, #tpu.memory_space<vmem>>, vector<8x8xf32>,
    return
  }
  func.func @transform_0(%arg0: i32) -> (i32, i32, i32) {
    %c0_i32 = arith.constant 0 : i32
    %c0_i32_0 = arith.constant 0 : i32
    %c0_i32_1 = arith.constant 0 : i32
    return %arg0, %c0_i32, %c0_i32_0 : i32, i32, i32
  }
  func.func @transform_1(%arg0: i32) -> (i32, i32) {
    %c0_i32 = arith.constant 0 : i32
    %c0_i32_0 = arith.constant 0 : i32
    %c0_i32_1 = arith.constant 0 : i32
    return %c0_i32, %c0_i32_0 : i32, i32
  }
  func.func @transform_2(%arg0: i32) -> (i32, i32) {
    %c0_i32 = arith.constant 0 : i32
    %c0_i32_0 = arith.constant 0 : i32
    %c0_i32_1 = arith.constant 0 : i32
    return %c0_i32, %c0_i32_0 : i32, i32
  }
  func.func @transform_3(%arg0: i32) -> (i32, i32) {
    %c0_i32 = arith.constant 0 : i32
    %c0_i32_0 = arith.constant 0 : i32
    %c0_i32_1 = arith.constant 0 : i32
    return %c0_i32, %c0_i32_0 : i32, i32
  }
  func.func @transform_4(%arg0: i32) -> (i32, i32) {
    %c0_i32 = arith.constant 0 : i32
    %c0_i32_0 = arith.constant 0 : i32
    %c0_i32_1 = arith.constant 0 : i32
    return %c0_i32, %c0_i32_0 : i32, i32
  }
  func.func @transform_5(%arg0: i32) -> (i32, i32) {
    %c0_i32 = arith.constant 0 : i32
    %c0_i32_0 = arith.constant 0 : i32
    %c0_i32_1 = arith.constant 0 : i32
    return %c0_i32, %c0_i32_0 : i32, i32
  }
  func.func @transform_6(%arg0: i32) -> (i32, i32) {
    %c0_i32 = arith.constant 0 : i32
    %c0_i32_0 = arith.constant 0 : i32
    return %arg0, %c0_i32 : i32, i32
  }
  func.func @transform_7(%arg0: i32) -> (i32, i32) {
    %c0_i32 = arith.constant 0 : i32
    %c0_i32_0 = arith.constant 0 : i32
    %c0_i32_1 = arith.constant 0 : i32
    return %c0_i32, %c0_i32_0 : i32, i32
  }
  func.func @transform_8(%arg0: i32) -> (i32, i32) {
    %c0_i32 = arith.constant 0 : i32
    %c0_i32_0 = arith.constant 0 : i32
    %c0_i32_1 = arith.constant 0 : i32
    return %c0_i32, %c0_i32_0 : i32, i32
  }
}

</mosaic_0001>

<bundles_post_ra>
// kernel: tpu_custom_call.1
= control target key start
LH: loop header
LB: loop body
LE: loop exit
PB: predicated region body
PF: predicated region fallthrough
CT: control target
= control target key end

     0   :  { %s718_s0 = inlined_call_operand.hbm [shape: f32[8,8,128], index: 0, kind: input, shape index: {}]   ;;  %s719_s1 = inlined_call_operand.hbm [shape: f32[32,128], index: 1, kind: input, shape index: {}]   ;;  %s720_s2 = inlined_call_operand.vmem [shape: f32[1,32], index: 2, kind: input, shape index: {}]   ;;  %s721_s3 = inlined_call_operand.<no memory space> [shape: f32[1,1], index: 3, kind: input, shape index: {}]   ;;  %s722_s4 = inlined_call_operand.hbm [shape: f32[8,32], index: 4, kind: input, shape index: {}]   ;;  %s723_s5 = inlined_call_operand.hbm [shape: f32[8,32], index: 5, kind: input, shape index: {}]   ;;  %s724_s6 = inlined_call_operand.hbm [shape: f32[8,8], index: 6, kind: output, shape index: {0}]   ;;  %s725_s7 = inlined_call_operand.hbm [shape: f32[8,32], index: 7, kind: output, shape index: {1}]   ;;  %s726_s8 = inlined_call_operand.hbm [shape: f32[8,32], index: 8, kind: output, shape index: {2}]  }
   0x1   :  { %v14_v0 = vstv %s721_s3 }
   0x2   :  { %15 = vst [vmem:[#allocation3] sm:$0x1] %v14_v0 }
   0x3   :  { %16 = vsyncpa [#allocation5], 0 }
   0x4   :  { %17 = vsyncpa [#allocation8], 0 }
   0x5   :  { %18 = vsyncpa [#allocation11], 0 }
   0x6   :  { %19 = vsyncpa [#allocation6], 0 }
   0x7   :  { %20 = vsyncpa [#allocation14], 0  ;;  %s38_s9 = sshll.u32 %s719_s1, 4  ;;  %s580_s10 = smov [#allocation7]   ;;  %s39_s9 = int_to_ptr.hbm [resolvable:$true] %s38_s9 }
   0x8   :  { %s40_s11 = sshll.u32 %s580_s10, 4  ;;  %s25_s14 = sshll.u32 %s718_s0, 4  ;;  %s41_s11 = int_to_ptr.vmem [resolvable:$true] %s40_s11  ;;  %s26_s14 = int_to_ptr.hbm [resolvable:$true] %s25_s14 }
   0x9   :  { %s581_s15 = smov 128   ;;  %s582_s3 = smov 8  }
   0xa   :  { %46 = dma.hbm_to_vmem [thread:$0]  %s39_s9, 512, %s41_s11, [#allocation8], %s581_s15, %s581_s15, %s582_s3  }
   0xb   :  { %s583_s16 = smov [#allocation4]   ;;  %s56_s20 = sshll.u32 %s722_s4, 4  ;;  %s57_s20 = int_to_ptr.hbm [resolvable:$true] %s56_s20 }
   0xc   :  { %s27_s17 = sshll.u32 %s583_s16, 4  ;;  %s67_s22 = sshll.u32 %s723_s5, 4  ;;  %s28_s17 = int_to_ptr.vmem [resolvable:$true] %s27_s17  ;;  %s68_s22 = int_to_ptr.hbm [resolvable:$true] %s67_s22 }
   0xd   :  { %33 = dma.hbm_to_vmem [thread:$0]  %s26_s14, 1024, %s28_s17, [#allocation5], %s581_s15, %s581_s15, %s582_s3  }
   0xe   :  { %s584_s23 = smov [#allocation9]   ;;  %s585_s0 = smov [#allocation10]  }
   0xf   :  { %s58_s24 = sshll.u32 %s584_s23, 4  ;;  %s69_s25 = sshll.u32 %s585_s0, 4  ;;  %s59_s24 = int_to_ptr.vmem [resolvable:$true] %s58_s24  ;;  %s70_s25 = int_to_ptr.vmem [resolvable:$true] %s69_s25 }
  0x10   :  { %61 = dma.hbm_to_vmem [thread:$0]  %s57_s20, 128, %s59_s24, [#allocation8]  }
  0x11   :  { %72 = dma.hbm_to_vmem [thread:$0]  %s68_s22, 128, %s70_s25, [#allocation11]  }
  0x12   :  { %566 = dma.done.wait [#allocation5], 1024  }
  0x13   :  { %567 = vsyncadd [#allocation5], 4294966272 }
  0x14   :  { %568 = dma.done.wait [#allocation8], 640  }
  0x15   :  { %569 = vsyncadd [#allocation8], 4294966656 }
  0x16   :  { %570 = dma.done.wait [#allocation11], 128  }
  0x17   :  { %571 = vsyncadd [#allocation11], 4294967168  ;;  %vm94_vm0 = vcmask 261120   ;;  %v586_v1 = vmov 0.0   ;;  %v660_v2 = vld [vmem:[#allocation7] sm:$0xff]  ;;  %v662_v3 = vld [vmem:[#allocation7 + $0x8] sm:$0xff] }
  0x18   :  { %98 = vst.msk [vmem:[#allocation2] sm:$0xff] %vm94_vm0, %v586_v1  ;;  %v664_v4 = vld [vmem:[#allocation7 + $0x10] sm:$0xff]  ;;  %v667_v5 = vld [vmem:[#allocation7 + $0x18] sm:$0xff]  ;;  %v93_v6 = vld [vmem:[#allocation9] sm:$0xff]  ;;  %s672_s4 = smov 0  }
  0x19   :  { %99 = vst.msk [vmem:[#allocation2 + $0x8] sm:$0xff] %vm94_vm0, %v586_v1  ;;  %v96_v7 = vld [vmem:[#allocation10] sm:$0xff] }
  0x1a   :  { %100 = vst.msk [vmem:[#allocation2 + $0x10] sm:$0xff] %vm94_vm0, %v586_v1 }
  0x1b   :  { %101 = vst.msk [vmem:[#allocation2 + $0x18] sm:$0xff] %vm94_vm0, %v586_v1 }
  0x1c   :  { %102 = vst.msk [vmem:[#allocation2 + $0x20] sm:$0xff] %vm94_vm0, %v586_v1 }
  0x1d   :  { %103 = vst.msk [vmem:[#allocation2 + $0x28] sm:$0xff] %vm94_vm0, %v586_v1 }
  0x1e   :  { %104 = vst.msk [vmem:[#allocation2 + $0x30] sm:$0xff] %vm94_vm0, %v586_v1 }
  0x1f   :  { %105 = vst.msk [vmem:[#allocation2 + $0x38] sm:$0xff] %vm94_vm0, %v586_v1 }
  0x20   :  { %95 = vst.msk [vmem:[#allocation13] sm:$0xff] %vm94_vm0, %v93_v6 }
  0x21   :  { %97 = vst.msk [vmem:[#allocation15] sm:$0xff] %vm94_vm0, %v96_v7 }
  0x22 LB: > { %141 = vmatpush.msra.mxu0 %v667_v5  ;;  %s357_s5 = sshll.u32 %s578_s4, 3  ;;  %s587_s27 = smov 64   ;;  %s578_s4 = sphi %s672_s4, %s117_s4  }
  0x23   : > { %s123_s26 = scalar_lea.vmem [#allocation4], %s357_s5  ;;  %s588_s28 = smov 32  }
  0x24   : > { %142 = vmatpush.msra.mxu0 %v664_v4  ;;  %v124_v9 = vld [vmem:[%s123_s26] sm:$0xff]  ;;  %s589_s29 = smov 96   ;;  %s201_s30 = scalar_lea.vmem [#allocation2], %s357_s5 }
  0x25   : > { %s117_s4 = sadd.s32 1, %s578_s4  }
  0x26   : > { %143 = vmatpush.msra.mxu0 %v662_v3  ;;  %p116_p0 = scmp.ge.s32.totalorder %s117_s4, 8 }
  0x27   : > { %v120_v8 = vld [vmem:[#allocation13] sm:$0xff]  ;;  %v590_v42 = vmov (%p116_p0), 0   ;;  %s316_s12 = sshll.u32 (%p116_p0), %s725_s7, 4  ;;  %s591_s13 = smov (%p116_p0), [#allocation13]   ;;  %v271_v7 = vlaneseq (%p116_p0)  ;;  %vm281_vm5 = vcmask (%p116_p0), 1041409   ;;  %vm283_vm6 = vcmask (%p116_p0), 1042434   ;;  %s317_s12 = int_to_ptr.hbm [resolvable:$true] %s316_s12 }
  0x28   : > { %144 = vmatpush.msra.mxu0 %v660_v2  ;;  %v121_v13 = vld [vmem:[#allocation15] sm:$0xff]  ;;  %v392_v39 = vld [vmem:[%s720_s2] ss:$0 sm:$0xff] (%p116_p0)  ;;  %390 = vset.pattern.permute.xlu1 (%p116_p0), %v590_v42  ;;  %s314_s14 = sshll.u32 (%p116_p0), %s591_s13, 4  ;;  %s592_s15 = smov (%p116_p0), [#allocation15]   ;;  %vm285_vm7 = vcmask (%p116_p0), 1043459   ;;  %s315_s14 = int_to_ptr.vmem [resolvable:$true] %s314_s14 }
  0x29   : > { %358 = vmatmul.msk.f32.vlgmr.msra.gmra.mxu0 %vm94_vm0, %v120_v8  ;;  %391 = vset.pattern.permute.xlu0 (%p116_p0), %v590_v42  ;;  %s325_s3 = sshll.u32 (%p116_p0), %s592_s15, 4  ;;  %s327_s18 = sshll.u32 (%p116_p0), %s726_s8, 4  ;;  %v393_v0 = vld [vmem:[#allocation3] ss:$0 sm:$0xff] (%p116_p0)  ;;  %v272_v8 = vand.u32 (%p116_p0), 127, %v271_v7  ;;  %vm287_vm8 = vcmask (%p116_p0), 1044484   ;;  %s326_s3 = int_to_ptr.vmem [resolvable:$true] %s325_s3  ;;  %s328_s18 = int_to_ptr.hbm [resolvable:$true] %s327_s18 }
  0x2a   :  { %vm289_vm9 = vcmask (%p116_p0), 1045509   ;;  %vm291_vm10 = vcmask (%p116_p0), 1046534   ;;  %s593_s7 = smov (%p116_p0), [#allocation12]   ;;  %s305_s1 = sshll.u32 (%p116_p0), %s724_s6, 4  ;;  %vm293_vm11 = vcmask (%p116_p0), 1047559   ;;  %vm296_vm12 = vcmask (%p116_p0), 64512   ;;  %s306_s1 = int_to_ptr.hbm [resolvable:$true] %s305_s1 }
  0x2b   :  { %s303_s8 = sshll.u32 (%p116_p0), %s593_s7, 4  ;;  %s304_s8 = int_to_ptr.vmem [resolvable:$true] %s303_s8 }
  0xa6   : > { %v146_v10 = vpop.f32.mrf.mxu0 }
  0xa7   : > { %v149_v11 = vadd.f32 %v146_v10, %v124_v9 }
  0xa9   : > { %382 = vtanh.f32 %v149_v11  ;;  %v359_v14 = vmul.f32 -1.442695, %v149_v11 }
  0xab   : > { %384 = vpow2.f32 %v359_v14 }
  0xaf   : > { %v383_v12 = vpop.eup %382 }
  0xb0   : > { %176 = vrot.lane.b32.xlu0 %v383_v12, %s587_s27 }
  0xb1   : > { %v385_v15 = vpop.eup %384 }
  0xb2   : > { %v153_v16 = vadd.f32 1.0, %v385_v15 }
  0xb4   : > { %386 = vrcp.f32 %v153_v16  ;;  %v165_v22 = vand.u32 2147483648, %v153_v16  ;;  %vm159_vm2 = vweird.f32 %v153_v16  ;;  %v163_v23 = vand.u32 2147483647, %v153_v16 }
  0xb6   : > { %v166_v25 = vor.u32 1.1754944e-38, %v165_v22  ;;  %vm164_vm4 = vcmp.eq.f32.partialorder %v163_v23, 8.507059e+37 }
  0xb8   : > { %171 = vrot.lane.b32.xlu0 %v121_v13, %s588_s28 }
  0xba   : > { %v387_v17 = vpop.eup %386 }
  0xbb   : > { %v155_v18 = vmul.f32 %v387_v17, %v153_v16  ;;  %vm160_vm1 = vweird.f32 %v387_v17 }
  0xbc   : > { %vm161_vm3 = vmor %vm159_vm2, %vm160_vm1 }
  0xbd   : > { %v156_v19 = vsub.f32 1.0, %v155_v18 }
  0xbf   : > { %v157_v20 = vmul.f32 %v387_v17, %v156_v19 }
  0xc1   : > { %v158_v21 = vadd.f32 %v387_v17, %v157_v20 }
  0xc3   : > { %v162_v24 = vsel %vm161_vm3, %v387_v17, %v158_v21 }
  0xc4   : > { %v167_v27 = vsel %vm164_vm4, %v166_v25, %v162_v24 }
 0x122   : > { %v177_v26 = vpop.permute.xlu0 %176 }
 0x123   : > { %v179_v28 = vmul.f32 %v177_v26, %v167_v27 }
 0x125   : > { %181 = vrot.lane.b32.xlu1 %v179_v28, %s588_s28 }
 0x12a   : > { %v172_v29 = vpop.permute.xlu0 %171 }
 0x12b   : > { %v174_v30 = vmul.f32 %v172_v29, %v167_v27 }
 0x197   : > { %v182_v31 = vpop.permute.xlu1 %181 }
 0x198   : > { %v184_v32 = vadd.f32 %v182_v31, %v174_v30 }
 0x19a   : > { %388 = vtanh.f32 %v184_v32 }
 0x1a0   : > { %v389_v33 = vpop.eup %388 }
 0x1a1   : > { %187 = vrot.lane.b32.xlu1 %v389_v33, %s587_s27 }
 0x213   : > { %v188_v34 = vpop.permute.xlu1 %187 }
 0x214   : > { %v190_v35 = vmul.f32 %v188_v34, %v167_v27 }
 0x216   : > { %192 = vrot.lane.b32.xlu2 %v190_v35, %s588_s28 }
 0x21e   : > { %197 = vrot.lane.b32.xlu2 %v184_v32, %s589_s29 }
 0x270   : > { %v193_v36 = vpop.permute.xlu2 %192 }
 0x271   : > { %195 = vst.msk [vmem:[#allocation13] sm:$0xff] %vm94_vm0, %v193_v36 }
 0x272   : > { %202 = vst.msk [vmem:[%s201_s30] sm:$0xff] %vm94_vm0, %v193_v36  ;;  %319 = dma.vmem_to_hbm [thread:$0]  (%p116_p0), %s315_s14, 128, %s317_s12, [#allocation14]  }
 0x275   :  { %119 = sbr.rel (!%p116_p0) target bundleno = 34 (0x22), region = 89 }
 0x278   : > { %v198_v37 = vpop.permute.xlu2 %197 }
 0x279   : > { %200 = vst.msk [vmem:[#allocation15] sm:$0xff] %vm94_vm0, %v198_v37  ;;  %v205_v38 = vld [vmem:[#allocation2 + $0x10] sm:$0xff] (%p116_p0)  ;;  %v203_v40 = vld [vmem:[#allocation2] sm:$0xff] (%p116_p0)  ;;  %v206_v41 = vld [vmem:[#allocation2 + $0x18] sm:$0xff] (%p116_p0) }
 0x27a   :  { %v217_v43 = vmul.f32 %v392_v39, %v205_v38  ;;  %v215_v44 = vmul.f32 %v392_v39, %v203_v40  ;;  %v218_v45 = vmul.f32 %v392_v39, %v206_v41  ;;  %v204_v46 = vld [vmem:[#allocation2 + $0x8] sm:$0xff]  ;;  %v207_v50 = vld [vmem:[#allocation2 + $0x20] sm:$0xff]  ;;  %v209_v56 = vld [vmem:[#allocation2 + $0x30] sm:$0xff]  ;;  %330 = dma.vmem_to_hbm [thread:$0]  %s326_s3, 128, %s328_s18, [#allocation14]  }
 0x27b   :  { %v216_v51 = vmul.f32 %v392_v39, %v204_v46  ;;  %v219_v52 = vmul.f32 %v392_v39, %v207_v50  ;;  %v208_v55 = vld [vmem:[#allocation2 + $0x28] sm:$0xff]  ;;  %v221_v58 = vmul.f32 %v392_v39, %v209_v56  ;;  %v210_v61 = vld [vmem:[#allocation2 + $0x38] sm:$0xff] }
 0x27c   :  { %v230_v47 = vsel %vm94_vm0, %v217_v43, 0.0  ;;  %v224_v48 = vsel %vm94_vm0, %v215_v44, 0.0  ;;  %v233_v49 = vsel %vm94_vm0, %v218_v45, 0.0  ;;  %v220_v57 = vmul.f32 %v392_v39, %v208_v55 }
 0x27d   :  { %231 = vadd.xlane.f32.xlu1 %v230_v47  ;;  %225 = vadd.xlane.f32.xlu0 %v224_v48  ;;  %v227_v53 = vsel %vm94_vm0, %v216_v51, 0.0  ;;  %v236_v54 = vsel %vm94_vm0, %v219_v52, 0.0  ;;  %v242_v60 = vsel %vm94_vm0, %v221_v58, 0.0  ;;  %v222_v62 = vmul.f32 %v392_v39, %v210_v61 }
 0x27e   :  { %234 = vadd.xlane.f32.xlu2 %v233_v49  ;;  %v239_v59 = vsel %vm94_vm0, %v220_v57, 0.0 }
 0x27f   :  { %v245_v63 = vsel %vm94_vm0, %v222_v62, 0.0 }
 0x285   :  { %228 = vadd.xlane.f32.xlu0 %v227_v53 }
 0x286   :  { %237 = vadd.xlane.f32.xlu2 %v236_v54 }
 0x28d   :  { %240 = vadd.xlane.f32.xlu0 %v239_v59 }
 0x28e   :  { %243 = vadd.xlane.f32.xlu2 %v242_v60 }
 0x295   :  { %246 = vadd.xlane.f32.xlu0 %v245_v63 }
 0x296   :  { %252 = vperm.xlu1 %390, %v393_v0  }
 0x2f0   :  { %v226_v1 = vpop.xlane.xlu0 %225  ;;  %v232_v5 = vpop.xlane.xlu1 %231 }
 0x2f1   :  { %v235_v2 = vpop.xlane.xlu2 %234 }
 0x2f8   :  { %v229_v3 = vpop.xlane.xlu0 %228 }
 0x2f9   :  { %v238_v4 = vpop.xlane.xlu2 %237 }
 0x300   :  { %v241_v6 = vpop.xlane.xlu0 %240 }
 0x301   :  { %v244_v10 = vpop.xlane.xlu2 %243 }
 0x308   :  { %v253_v9 = vpop.permute.xlu1 %252  ;;  %v247_v16 = vpop.xlane.xlu0 %246 }
 0x309   :  { %v255_v11 = vadd.f32 %v253_v9, %v226_v1  ;;  %v256_v12 = vadd.f32 %v253_v9, %v229_v3  ;;  %v257_v13 = vadd.f32 %v253_v9, %v232_v5  ;;  %v258_v14 = vadd.f32 %v253_v9, %v235_v2 }
 0x30a   :  { %v259_v15 = vadd.f32 %v253_v9, %v238_v4  ;;  %v260_v20 = vadd.f32 %v253_v9, %v241_v6  ;;  %v261_v21 = vadd.f32 %v253_v9, %v244_v10  ;;  %v262_v22 = vadd.f32 %v253_v9, %v247_v16 }
 0x30b   :  { %v273_v17 = vperm.slane %v255_v11, %v272_v8  ;;  %v274_v18 = vperm.slane %v256_v12, %v272_v8  ;;  %v275_v19 = vperm.slane %v257_v13, %v272_v8  ;;  %v276_v23 = vperm.slane %v258_v14, %v272_v8 }
 0x30c   :  { %v277_v25 = vperm.slane %v259_v15, %v272_v8  ;;  %v278_v27 = vperm.slane %v260_v20, %v272_v8  ;;  %v279_v29 = vperm.slane %v261_v21, %v272_v8  ;;  %v280_v31 = vperm.slane %v262_v22, %v272_v8 }
 0x30d   :  { %v282_v24 = vsel %vm281_vm5, %v274_v18, %v273_v17 }
 0x30e   :  { %v284_v26 = vsel %vm283_vm6, %v275_v19, %v282_v24 }
 0x30f   :  { %v286_v28 = vsel %vm285_vm7, %v276_v23, %v284_v26 }
 0x310   :  { %v288_v30 = vsel %vm287_vm8, %v277_v25, %v286_v28 }
 0x311   :  { %v290_v32 = vsel %vm289_vm9, %v278_v27, %v288_v30 }
 0x312   :  { %v292_v33 = vsel %vm291_vm10, %v279_v29, %v290_v32 }
 0x313   :  { %v294_v34 = vsel %vm293_vm11, %v280_v31, %v292_v33 }
 0x314   :  { %297 = vst.msk [vmem:[#allocation12] sm:$0xff] %vm296_vm12, %v294_v34 }
 0x315   :  { %308 = dma.vmem_to_hbm [thread:$0]  %s304_s8, 128, %s306_s1, [#allocation6]  }
 0x316   :  { %572 = dma.done.wait [#allocation6], 128  }
 0x317   :  { %573 = vsyncadd [#allocation6], 4294967168 }
 0x318   :  { %574 = dma.done.wait [#allocation14], 256  }
 0x319   :  { %575 = vsyncadd [#allocation14], 4294967040 }
 0x31a   :  { %343 = vsyncpa [#allocation5], 1 }
 0x31b   :  { %344 = vsyncpa [#allocation8], 1 }
 0x31c   :  { %345 = vsyncpa [#allocation11], 1 }
 0x31d   :  { %346 = vsyncpa [#allocation6], 1 }
 0x31e   :  { %347 = vsyncpa [#allocation14], 1 }

</bundles_post_ra>
